<compile_context>
chip_gen: v5e
topology: v5e:2x2
jax: 0.10.0
libtpu: 0.0.40
codegen_flags: <defaults>
</compile_context>

<pallas_src>
import math
import jax
import jax.numpy as jnp
from jax.experimental import pallas as pl
from jax.experimental.pallas import tpu as pltpu


def _round_up(a: int, b: int) -> int:
    return ((a + b - 1) // b) * b


_VMEM_LIMIT_BYTES = 48 * 1024 * 1024       # safe limit on v5e/v6e (128 MiB) and v7x (64 MiB)
_FAST_PATH_VMEM_BUDGET = 40 * 1024 * 1024  # headroom under the limit (counts double buffers)


# ---------------------------------------------------------------------------
# Fast path kernel: weight + bias resident in VMEM, 1-D grid over row blocks.
# ---------------------------------------------------------------------------
def _linear_fast_kernel(x_ref, w_ref, b_ref, o_ref):
    acc = jnp.dot(x_ref[...], w_ref[...], preferred_element_type=jnp.float32)
    o_ref[...] = (acc + b_ref[...].astype(jnp.float32)).astype(o_ref.dtype)


# ---------------------------------------------------------------------------
# General path kernel factory: (rows, out-cols, K) grid, f32 accumulator.
# Bias folded into the k==0 accumulator init; K tail masked in-kernel when
# C_in is not a multiple of the K tile (so x never needs padding).
# ---------------------------------------------------------------------------
def _make_tiled_kernel(k_rem: int):
    def kernel(x_ref, w_ref, b_ref, o_ref, acc_ref):
        k = pl.program_id(2)
        nk = pl.num_programs(2)

        @pl.when(k == 0)
        def _():
            acc_ref[...] = jnp.broadcast_to(
                b_ref[...].astype(jnp.float32), acc_ref.shape)

        xv = x_ref[...]
        wv = w_ref[...]
        if k_rem:  # static: emitted only when there is a K-tile remainder
            not_last = k != nk - 1
            kx = jax.lax.broadcasted_iota(jnp.int32, xv.shape, 1)
            xv = jnp.where(jnp.logical_or(not_last, kx < k_rem),
                           xv, jnp.zeros_like(xv))
            kw = jax.lax.broadcasted_iota(jnp.int32, wv.shape, 0)
            wv = jnp.where(jnp.logical_or(not_last, kw < k_rem),
                           wv, jnp.zeros_like(wv))

        acc_ref[...] += jnp.dot(xv, wv, preferred_element_type=jnp.float32)

        @pl.when(k == nk - 1)
        def _():
            o_ref[...] = acc_ref[...].astype(o_ref.dtype)

    return kernel


def pallas_linear(x: jax.Array, w: jax.Array, b: jax.Array, *,
                  row_tile: int = 256, use_bf16: bool = False,
                  force_tiled: bool = False) -> jax.Array:
    """y = x @ w + b with channels on the last axis. No padding of x or y."""
    N, C_in = x.shape
    C_in_w, C_out = w.shape
    assert C_in == C_in_w, f"{C_in} != {C_in_w}"
    out_dtype = x.dtype

    if use_bf16:
        # bf16 MXU operands, f32 accumulation, output in the original dtype.
        x = x.astype(jnp.bfloat16)
        w = w.astype(jnp.bfloat16)
    in_itemsize = jnp.dtype(x.dtype).itemsize
    out_itemsize = jnp.dtype(out_dtype).itemsize
    b2d = b.reshape(1, C_out)

    cost = pl.CostEstimate(
        flops=2 * N * C_in * C_out,
        transcendentals=0,
        bytes_accessed=(N * C_in + C_in * C_out) * in_itemsize
        + C_out * jnp.dtype(b.dtype).itemsize
        + N * C_out * out_itemsize,
    )

    # Row tile: never pad N; the last row block may be partial (OOB rows are
    # never written back). Guarantee >= 2 row blocks when N allows so both of
    # v7x's TensorCores get work on the "parallel" axis.
    tm = min(row_tile, _round_up(N, 8))
    if pl.cdiv(N, tm) < 2 and N > 16:
        tm = _round_up(pl.cdiv(N, 2), 8)
    n_row_blocks = pl.cdiv(N, tm)

    # Fast-path eligibility: resident weight (conservatively counted double
    # buffered) plus one double-buffered row block of x and y fits in VMEM.
    fast_bytes = (2 * C_in * C_out * in_itemsize      # resident weight
                  + 2 * tm * C_in * in_itemsize       # x tile (double buffer)
                  + 2 * tm * C_out * out_itemsize     # y tile (double buffer)
                  + 2 * C_out * 4)                    # bias
    if fast_bytes <= _FAST_PATH_VMEM_BUDGET and not force_tiled:
        return pl.pallas_call(
            _linear_fast_kernel,
            out_shape=jax.ShapeDtypeStruct((N, C_out), out_dtype),
            grid_spec=pltpu.PrefetchScalarGridSpec(
                num_scalar_prefetch=0,
                grid=(n_row_blocks,),
                in_specs=[
                    pl.BlockSpec((tm, C_in), lambda i: (i, 0)),      # x rows
                    pl.BlockSpec((C_in, C_out), lambda i: (0, 0)),   # w resident
                    pl.BlockSpec((1, C_out), lambda i: (0, 0)),      # b resident
                ],
                out_specs=pl.BlockSpec((tm, C_out), lambda i: (i, 0)),
            ),
            compiler_params=pltpu.CompilerParams(
                dimension_semantics=("parallel",),
                vmem_limit_bytes=_VMEM_LIMIT_BYTES,
            ),
            cost_estimate=cost,
        )(x, w, b2d)

    # General tiled path (weights too big for VMEM residency).
    tm_g = min(512, _round_up(N, 8))
    tn_g = C_out if C_out <= 512 else 512
    tk_g = C_in if C_in <= 1024 else 1024
    k_rem = C_in % tk_g if C_in > tk_g else 0
    grid = (pl.cdiv(N, tm_g), pl.cdiv(C_out, tn_g), pl.cdiv(C_in, tk_g))

    return pl.pallas_call(
        _make_tiled_kernel(k_rem),
        out_shape=jax.ShapeDtypeStruct((N, C_out), out_dtype),
        grid_spec=pltpu.PrefetchScalarGridSpec(
            num_scalar_prefetch=0,
            grid=grid,
            in_specs=[
                pl.BlockSpec((tm_g, tk_g), lambda i, j, k: (i, k)),
                pl.BlockSpec((tk_g, tn_g), lambda i, j, k: (k, j)),
                pl.BlockSpec((1, tn_g), lambda i, j, k: (0, j)),
            ],
            out_specs=pl.BlockSpec((tm_g, tn_g), lambda i, j, k: (i, j)),
            scratch_shapes=[pltpu.VMEM((tm_g, tn_g), jnp.float32)],
        ),
        compiler_params=pltpu.CompilerParams(
            dimension_semantics=("parallel", "parallel", "arbitrary"),
            vmem_limit_bytes=_VMEM_LIMIT_BYTES,
        ),
        cost_estimate=cost,
    )(x, w, b2d)


def init_linear_params(key, in_channels: int, out_channels: int):
    """Matches the PyTorch module init: xavier_uniform_ for w, zeros for b."""
    bound = math.sqrt(6.0 / (in_channels + out_channels))
    w = jax.random.uniform(key, (in_channels, out_channels), dtype=jnp.float32,
                           minval=-bound, maxval=bound)
    b = jnp.zeros((out_channels,), dtype=jnp.float32)
    return w, b


def _assert_close(got, want, tol, name):
    got = got.astype(jnp.float32)
    want = want.astype(jnp.float32)
    err = float(jnp.max(jnp.abs(got - want)) / (jnp.max(jnp.abs(want)) + 1e-12))
    assert err < tol, f"{name}: relative error {err:.3e} >= {tol}"


if __name__ == "__main__":
    key = jax.random.PRNGKey(0)
    ks = jax.random.split(key, 8)

    # Case 1: small ragged row count, tiny channels -> fast path, zero padding
    # anywhere, two row blocks.  Bias is made non-zero to exercise the bias add
    # (the module itself initializes bias to zeros).
    N1, Ci1, Co1 = 200, 32, 64
    x1 = jax.random.normal(ks[0], (N1, Ci1), dtype=jnp.float32)
    w1, _ = init_linear_params(ks[1], Ci1, Co1)
    b1 = jax.random.normal(ks[2], (Co1,), dtype=jnp.float32)
    y1 = jax.block_until_ready(pallas_linear(x1, w1, b1))
    assert y1.shape == (N1, Co1)
    _assert_close(y1, x1 @ w1 + b1, 2e-2, "case1")

    # Case 1b: bf16 MXU operand path (f32 accumulation / f32 output).
    y1b = jax.block_until_ready(pallas_linear(x1, w1, b1, use_bf16=True))
    _assert_close(y1b, x1 @ w1 + b1, 5e-2, "case1_bf16")

    # Case 2: larger channel counts (640 -> 384), still the resident-weight
    # fast path -> previously this shape wasted 25-37% work on zero padding.
    N2, Ci2, Co2 = 391, 640, 384
    x2 = jax.random.normal(ks[3], (N2, Ci2), dtype=jnp.float32)
    w2, _ = init_linear_params(ks[4], Ci2, Co2)
    b2 = jax.random.normal(ks[5], (Co2,), dtype=jnp.float32)
    y2 = jax.block_until_ready(pallas_linear(x2, w2, b2))
    assert y2.shape == (N2, Co2)
    _assert_close(y2, x2 @ w2 + b2, 2e-2, "case2")

    # Case 3: force the general tiled path (K reduction with a non-tile-multiple
    # C_in -> in-kernel K-tail masking; C_out > tile -> multiple column blocks).
    N3, Ci3, Co3 = 160, 1536, 640
    x3 = jax.random.normal(ks[6], (N3, Ci3), dtype=jnp.float32)
    w3, _ = init_linear_params(ks[7], Ci3, Co3)
    b3 = jax.random.normal(ks[2], (Co3,), dtype=jnp.float32)
    y3 = jax.block_until_ready(pallas_linear(x3, w3, b3, force_tiled=True))
    assert y3.shape == (N3, Co3)
    _assert_close(y3, x3 @ w3 + b3, 2e-2, "case3_tiled")

    # TODO(synk): the ptensors0/1/2 container bookkeeping (atom lists, get_nc)
    # has no Pallas equivalent; this kernel implements the linear map on the
    # flattened (rows, channels) matrix that `linear(x, w, b)` operates on.
    print("KERNEL_OK")
</pallas_src>

<mosaic_0001>
module attributes {stable_mosaic.version = 11 : i64} {
  func.func @_linear_fast_kernel(%arg0: i32, %arg1: memref<104x32xf32, #tpu.memory_space<vmem>>, %arg2: memref<32x64xf32, #tpu.memory_space<vmem>>, %arg3: memref<1x64xf32, #tpu.memory_space<vmem>>, %arg4: memref<104x64xf32, #tpu.memory_space<vmem>>) attributes {dimension_semantics = [#tpu.dimension_semantics<parallel>], iteration_bounds = array<i64: 2>, scalar_prefetch = 0 : i64, scratch_operands = 0 : i64, tpu.core_type = #tpu.core_type<tc>, window_params = [{transform_indices = @transform_0, window_bounds = array<i64: 104, 32>}, {pipeline_mode = #tpu.pipeline_mode<synchronous>, transform_indices = @transform_1, window_bounds = array<i64: 32, 64>}, {pipeline_mode = #tpu.pipeline_mode<synchronous>, transform_indices = @transform_2, window_bounds = array<i64: 1, 64>}, {transform_indices = @transform_3, window_bounds = array<i64: 104, 64>}]} {
    %c0 = arith.constant 0 : index
    %c0_0 = arith.constant 0 : index
    %0 = vector.load %arg1[%c0, %c0_0] : memref<104x32xf32, #tpu.memory_space<vmem>>, vector<104x32xf32>
    %c0_1 = arith.constant 0 : index
    %c0_2 = arith.constant 0 : index
    %1 = vector.load %arg2[%c0_1, %c0_2] : memref<32x64xf32, #tpu.memory_space<vmem>>, vector<32x64xf32>
    %cst = arith.constant dense<0.000000e+00> : vector<104x64xf32>
    %2 = tpu.matmul %0, %1, %cst {dimension_numbers = #tpu.dot_dimension_numbers<[1], [0], [0], [1], [0, 0, 1, 1], [], []>} : vector<104x32xf32>, vector<32x64xf32>, vector<104x64xf32> -> vector<104x64xf32>
    %c0_3 = arith.constant 0 : index
    %c0_4 = arith.constant 0 : index
    %3 = vector.load %arg3[%c0_3, %c0_4] : memref<1x64xf32, #tpu.memory_space<vmem>>, vector<1x64xf32>
    %4 = vector.broadcast %3 : vector<1x64xf32> to vector<104x64xf32>
    %5 = arith.addf %2, %4 : vector<104x64xf32>
    %c0_5 = arith.constant 0 : index
    %c0_6 = arith.constant 0 : index
    %6 = vector.load %arg4[%c0_5, %c0_6] : memref<104x64xf32, #tpu.memory_space<vmem>>, vector<104x64xf32>
    tpu.vector_store %arg4[%c0_5, %c0_6], %5 {strides = array<i32>} : memref<104x64xf32, #tpu.memory_space<vmem>>, vector<104x64xf32>,
    return
  }
  func.func @transform_0(%arg0: i32) -> (i32, i32) {
    %c0_i32 = arith.constant 0 : i32
    %c0_i32_0 = arith.constant 0 : i32
    return %arg0, %c0_i32 : i32, i32
  }
  func.func @transform_1(%arg0: i32) -> (i32, i32) {
    %c0_i32 = arith.constant 0 : i32
    %c0_i32_0 = arith.constant 0 : i32
    %c0_i32_1 = arith.constant 0 : i32
    return %c0_i32, %c0_i32_0 : i32, i32
  }
  func.func @transform_2(%arg0: i32) -> (i32, i32) {
    %c0_i32 = arith.constant 0 : i32
    %c0_i32_0 = arith.constant 0 : i32
    %c0_i32_1 = arith.constant 0 : i32
    return %c0_i32, %c0_i32_0 : i32, i32
  }
  func.func @transform_3(%arg0: i32) -> (i32, i32) {
    %c0_i32 = arith.constant 0 : i32
    %c0_i32_0 = arith.constant 0 : i32
    return %arg0, %c0_i32 : i32, i32
  }
}

</mosaic_0001>

<bundles_post_ra>
// kernel: tpu_custom_call.1
= control target key start
LH: loop header
LB: loop body
LE: loop exit
PB: predicated region body
PF: predicated region fallthrough
CT: control target
= control target key end

     0   :  { %s837_s12 = smov 0   ;;  %s839_s13 = smov 0   ;;  %s1024_s0 = inlined_call_operand.vmem [shape: f32[200,32], index: 0, kind: input, shape index: {}]   ;;  %s1025_s1 = inlined_call_operand.vmem [shape: f32[32,64], index: 1, kind: input, shape index: {}]   ;;  %s1026_s2 = inlined_call_operand.vmem [shape: f32[1,64], index: 2, kind: input, shape index: {}]   ;;  %s1027_s3 = inlined_call_operand.vmem [shape: f32[200,64], index: 3, kind: output, shape index: {}]  }
   0x1   :  { %s841_s14 = smov 0  }
   0x2 LB: > { %s850_s15 = sadd.s32 4294967295, %s783_s14   ;;  %s852_s16 = sadd.s32 1, %s783_s14   ;;  %s783_s14 = sphi %s841_s14, %s1036_s14   ;;  %s779_s13 = sphi %s839_s13, %s1035_s13   ;;  %s775_s12 = sphi %s837_s12, %s1034_s12  }
   0x3   : > { %s85_s17 = ssub.s32 %s783_s14, %s852_s16  ;;  %s88_s18 = sadd.s32 1, %s779_s13 }
   0x4   : > { %p86_p0 = scmp.eq.s32.totalorder %s85_s17, 0  ;;  %p98_p1 = scmp.ne.s32.totalorder %s779_s13, %s775_s12 }
   0x5   : > { %p99_p2 = scmp.eq.s32.totalorder %s850_s15, 1  ;;  %p592_p3 = scmp.ge.s32.totalorder %s783_s14, 1 }
   0x6   : > { %s860_s19 = scalar_select %p86_p0, %s779_s13, %s88_s18  }
   0x7   : > { %p862_p4 = por %p99_p2, %p98_p1  ;;  %p146_p5 = scmp.lt.s32.totalorder %s783_s14, 3 }
   0x9   : > { %p147_p6 = pnand %p592_p3, %p146_p5 }
   0xa   : > { %s873_s25 = smul.u32 (!%p147_p6), 13, %s850_s15  ;;  %s170_s8 = sand.u32 (!%p147_p6), 1, %s775_s12  }
   0xb   : > { %150 = sbr.rel (%p147_p6) target bundleno = 244 (0xf4), region = 32 }
   0xc   : > { %p178_p7 = scmp.lt.s32.totalorder (!%p147_p6), %s873_s25, 24  ;;  %s632_s9 = smul.u32 (!%p147_p6), 104, %s170_s8 }
   0xe   : > { %s903_s14 = scalar_lea.vmem (!%p147_p6), [#allocation2], %s632_s9  }
  0x10   : > { %v208_v0 = vld [vmem:[%s1025_s1 + $0x18] sm:$0xff]  ;;  %v207_v1 = vld [vmem:[%s1025_s1 + $0x10] sm:$0xff]  ;;  %v206_v2 = vld [vmem:[%s1025_s1 + $0x8] sm:$0xff]  ;;  %s179_s30 = scalar_select %p178_p7, %s873_s25, 24  ;;  %vm213_vm0 = vcmask 261120   ;;  %vm309_vm1 = vcmask 523264  }
  0x11   : > { %621 = vmatpush.msra.mxu2 %v208_v0  ;;  %622 = vmatpush.msra.mxu3 %v208_v0  ;;  %v205_v3 = vld [vmem:[%s1025_s1] sm:$0xff]  ;;  %s331_s12 = ssub.s32 (%p862_p4), 25, %s873_s25  ;;  %s619_s17 = smul.u32 (%p862_p4), 104, %s850_s15 }
  0x12   : > { %265 = vmatpush.msra.mxu0 %v208_v0  ;;  %620 = vmatpush.msra.mxu1 %v208_v0  ;;  %s593_s4 = sshll.u32 %s179_s30, 3  ;;  %v722_v17 = vld [vmem:[%s1026_s2] ss:$0 sm:$0xff]  ;;  %p332_p8 = scmp.lt.s32.totalorder (%p862_p4), %s331_s12, 13 }
  0x13   : > { %624 = vmatpush.msra.mxu2 %v207_v1  ;;  %625 = vmatpush.msra.mxu3 %v207_v1  ;;  %s181_s7 = scalar_lea.vmem %s1024_s0, %s593_s4  ;;  %s938_s22 = scalar_lea.vmem (%p862_p4), %s1027_s3, %s619_s17  }
  0x14   : > { %266 = vmatpush.msra.mxu0 %v207_v1  ;;  %623 = vmatpush.msra.mxu1 %v207_v1  ;;  %v198_v4 = vld [vmem:[%s181_s7 + $0x30] sm:$0xff]  ;;  %v192_v6 = vld [vmem:[%s181_s7] sm:$0xff]  ;;  %v195_v7 = vld [vmem:[%s181_s7 + $0x18] sm:$0xff] }
  0x15   : > { %627 = vmatpush.msra.mxu2 %v206_v2  ;;  %628 = vmatpush.msra.mxu3 %v206_v2  ;;  %v202_v5 = vld [vmem:[%s181_s7 + $0x50] sm:$0xff]  ;;  %v199_v8 = vld [vmem:[%s181_s7 + $0x38] sm:$0xff]  ;;  %v193_v10 = vld [vmem:[%s181_s7 + $0x8] sm:$0xff] }
  0x16   : > { %267 = vmatpush.msra.mxu0 %v206_v2  ;;  %626 = vmatpush.msra.mxu1 %v206_v2  ;;  %v203_v9 = vld [vmem:[%s181_s7 + $0x58] sm:$0xff]  ;;  %v196_v11 = vld [vmem:[%s181_s7 + $0x20] sm:$0xff]  ;;  %v194_v14 = vld [vmem:[%s181_s7 + $0x10] sm:$0xff] }
  0x17   : > { %630 = vmatpush.msra.mxu2 %v205_v3  ;;  %631 = vmatpush.msra.mxu3 %v205_v3  ;;  %v200_v12 = vld [vmem:[%s181_s7 + $0x40] sm:$0xff]  ;;  %v197_v15 = vld [vmem:[%s181_s7 + $0x28] sm:$0xff] }
  0x18   : > { %268 = vmatpush.msra.mxu0 %v205_v3  ;;  %629 = vmatpush.msra.mxu1 %v205_v3  ;;  %v204_v13 = vld [vmem:[%s181_s7 + $0x60] sm:$0xff]  ;;  %v201_v16 = vld [vmem:[%s181_s7 + $0x48] sm:$0xff] }
  0x19   : > { %600 = vmatmul.msk.f32.vlgmr.msra.gmra.mxu2 %vm213_vm0, %v198_v4  ;;  %604 = vmatmul.msk.f32.vlgmr.msra.gmra.mxu3 %vm213_vm0, %v202_v5 }
  0x1a   : > { %594 = vmatmul.msk.f32.vlgmr.msra.gmra.mxu0 %vm213_vm0, %v192_v6  ;;  %597 = vmatmul.msk.f32.vlgmr.msra.gmra.mxu1 %vm213_vm0, %v195_v7 }
  0x21   : > { %601 = vmatmul.msk.f32.gmra.mxu2 %vm213_vm0, %v199_v8  ;;  %605 = vmatmul.msk.f32.gmra.mxu3 %vm213_vm0, %v203_v9 }
  0x22   : > { %595 = vmatmul.msk.f32.gmra.mxu0 %vm213_vm0, %v193_v10  ;;  %598 = vmatmul.msk.f32.gmra.mxu1 %vm213_vm0, %v196_v11 }
  0x29   : > { %602 = vmatmul.msk.f32.gmra.mxu2 %vm213_vm0, %v200_v12  ;;  %606 = vmatmul.msk.f32.gmra.mxu3 %vm213_vm0, %v204_v13 }
  0x2a   : > { %596 = vmatmul.msk.f32.gmra.mxu0 %vm213_vm0, %v194_v14  ;;  %599 = vmatmul.msk.f32.gmra.mxu1 %vm213_vm0, %v197_v15 }
  0x31   : > { %603 = vmatmul.msk.f32.gmra.mxu2 %vm213_vm0, %v201_v16 }
  0x97   : > { %v270_v18 = vpop.f32.mrf.mxu0  ;;  %v279_v19 = vpop.f32.mrf.mxu1 }
  0x98   : > { %v271_v20 = vadd.f32 %v722_v17, %v270_v18  ;;  %v280_v21 = vadd.f32 %v722_v17, %v279_v19 }
  0x9a   : > { %310 = vst.msk [vmem:[%s903_s14] sm:$0xff] %vm309_vm1, %v271_v20 }
  0x9b   : > { %313 = vst.msk [vmem:[%s903_s14 + $0x18] sm:$0xff] %vm309_vm1, %v280_v21 }
  0x9c   : > { %v288_v22 = vpop.f32.mrf.mxu2  ;;  %v300_v23 = vpop.f32.mrf.mxu3 }
  0x9d   : > { %v289_v24 = vadd.f32 %v722_v17, %v288_v22  ;;  %v301_v25 = vadd.f32 %v722_v17, %v300_v23 }
  0x9f   : > { %316 = vst.msk [vmem:[%s903_s14 + $0x30] sm:$0xff] %vm309_vm1, %v289_v24  ;;  %v273_v26 = vpop.f32.mrf.mxu0  ;;  %v282_v27 = vpop.f32.mrf.mxu1 }
  0xa0   : > { %320 = vst.msk [vmem:[%s903_s14 + $0x50] sm:$0xff] %vm309_vm1, %v301_v25  ;;  %v274_v28 = vadd.f32 %v722_v17, %v273_v26  ;;  %v283_v29 = vadd.f32 %v722_v17, %v282_v27 }
  0xa2   : > { %311 = vst.msk [vmem:[%s903_s14 + $0x8] sm:$0xff] %vm309_vm1, %v274_v28 }
  0xa3   : > { %314 = vst.msk [vmem:[%s903_s14 + $0x20] sm:$0xff] %vm309_vm1, %v283_v29 }
  0xa4   : > { %v291_v30 = vpop.f32.mrf.mxu2  ;;  %v303_v31 = vpop.f32.mrf.mxu3 }
  0xa5   : > { %v292_v32 = vadd.f32 %v722_v17, %v291_v30  ;;  %v304_v33 = vadd.f32 %v722_v17, %v303_v31 }
  0xa7   : > { %317 = vst.msk [vmem:[%s903_s14 + $0x38] sm:$0xff] %vm309_vm1, %v292_v32  ;;  %v276_v34 = vpop.f32.mrf.mxu0  ;;  %v285_v35 = vpop.f32.mrf.mxu1 }
  0xa8   : > { %321 = vst.msk [vmem:[%s903_s14 + $0x58] sm:$0xff] %vm309_vm1, %v304_v33  ;;  %v277_v36 = vadd.f32 %v722_v17, %v276_v34  ;;  %v286_v37 = vadd.f32 %v722_v17, %v285_v35 }
  0xaa   : > { %312 = vst.msk [vmem:[%s903_s14 + $0x10] sm:$0xff] %vm309_vm1, %v277_v36 }
  0xab   : > { %315 = vst.msk [vmem:[%s903_s14 + $0x28] sm:$0xff] %vm309_vm1, %v286_v37 }
  0xac   : > { %v294_v38 = vpop.f32.mrf.mxu2  ;;  %v306_v39 = vpop.f32.mrf.mxu3 }
  0xad   : > { %v295_v40 = vadd.f32 %v722_v17, %v294_v38  ;;  %v307_v41 = vadd.f32 %v722_v17, %v306_v39 }
  0xaf   : > { %318 = vst.msk [vmem:[%s903_s14 + $0x40] sm:$0xff] %vm309_vm1, %v295_v40 }
  0xb0   : > { %322 = vst.msk [vmem:[%s903_s14 + $0x60] sm:$0xff] %vm309_vm1, %v307_v41 }
  0xb3   : > { %329 = sbr.rel (!%p862_p4) target bundleno = 244 (0xf4), region = 36 }
  0xb4   : > { %v297_v42 = vpop.f32.mrf.mxu2 }
  0xb5   : > { %v298_v43 = vadd.f32 %v722_v17, %v297_v42 }
  0xb7   : > { %319 = vst.msk [vmem:[%s903_s14 + $0x48] sm:$0xff] %vm309_vm1, %v298_v43 }
  0xb8   : > { %s1038_s12 = smov (!%p332_p8, %s331_s12), 13 }
  0xb9   : > { %s607_s23 = sshll.u32 %s1038_s12, 3 }
  0xba   : > { %p610_p9 = scmp.eq.s32.totalorder %s607_s23, 0 }
  0xbb   : > { %723 = sdivrem.u32 (!%p610_p9), %s1038_s12, 13 }
  0xbc   : > { %340 = sbr.rel (%p610_p9) target bundleno = 244 (0xf4), region = 40 }
  0xc4   : > { %s944_s20 = spop.drf %723 }
  0xc5   : > { %s725_s24 = spop.drf %723  ;;  %p611_p10 = scmp.le.s32.totalorder %s944_s20, 0 }
  0xc6   : > { %s1029_s15 = smov (!%p611_p10), %s938_s22  ;;  %s1030_s25 = smov (!%p611_p10), %s903_s14 }
  0xc7   : > { %545 = sbr.rel (%p611_p10) target bundleno = 218 (0xda), region = 116  ;;  %s953_s26 = smov (!%p611_p10), 0  }
  0xc8   : > { %s955_s27 = smov (!%p611_p10), 0  }
  0xcc LB: >> { %v429_v44 = vld [vmem:[%s791_s25] sm:$0xff]  ;;  %v431_v45 = vld [vmem:[%s791_s25 + $0x8] sm:$0xff]  ;;  %v433_v46 = vld [vmem:[%s791_s25 + $0x10] sm:$0xff]  ;;  %s455_s28 = sadd.s32 1, %s795_s26  ;;  %s423_s27 = sadd.s32 1, %s799_s27   ;;  %s799_s27 = sphi %s955_s27, %s423_s27   ;;  %s795_s26 = sphi %s953_s26, %s1033_s26   ;;  %s791_s25 = sphi %s1030_s25, %s1032_s25   ;;  %s787_s15 = sphi %s1029_s15, %s1031_s15  }
  0xcd   : >> { %430 = vst [vmem:[%s787_s15] sm:$0xff] %v429_v44  ;;  %v435_v47 = vld [vmem:[%s791_s25 + $0x18] sm:$0xff]  ;;  %p456_p11 = scmp.ge.s32.totalorder %s455_s28, %s944_s20  ;;  %v437_v48 = vld [vmem:[%s791_s25 + $0x20] sm:$0xff]  ;;  %v439_v49 = vld [vmem:[%s791_s25 + $0x28] sm:$0xff]  ;;  %p422_p12 = scmp.ge.s32.totalorder %s423_s27, %s944_s20 }
  0xce   : >> { %432 = vst [vmem:[%s787_s15 + $0x8] sm:$0xff] %v431_v45  ;;  %v441_v50 = vld [vmem:[%s791_s25 + $0x30] sm:$0xff]  ;;  %v443_v51 = vld [vmem:[%s791_s25 + $0x38] sm:$0xff]  ;;  %v445_v52 = vld [vmem:[%s791_s25 + $0x40] sm:$0xff] }
  0xcf   : >> { %434 = vst [vmem:[%s787_s15 + $0x10] sm:$0xff] %v433_v46  ;;  %s1040_s28 = smov (%p456_p11, %s455_s28), 0  ;;  %v447_v53 = vld [vmem:[%s791_s25 + $0x48] sm:$0xff]  ;;  %v449_v54 = vld [vmem:[%s791_s25 + $0x50] sm:$0xff]  ;;  %v451_v55 = vld [vmem:[%s791_s25 + $0x58] sm:$0xff] }
  0xd0   : >> { %436 = vst [vmem:[%s787_s15 + $0x18] sm:$0xff] %v435_v47  ;;  %s458_s29 = smul.u32 104, %s1040_s28  ;;  %v453_v56 = vld [vmem:[%s791_s25 + $0x60] sm:$0xff]  ;;  %s1033_s26 = smov %s1040_s28 }
  0xd1   : >> { %438 = vst [vmem:[%s787_s15 + $0x20] sm:$0xff] %v437_v48 }
  0xd2   : >> { %440 = vst [vmem:[%s787_s15 + $0x28] sm:$0xff] %v439_v49  ;;  %s460_s30 = scalar_lea.vmem %s903_s14, %s458_s29 [#allocation2]   ;;  %s461_s4 = scalar_lea.vmem %s938_s22, %s458_s29  }
  0xd3   : >> { %442 = vst [vmem:[%s787_s15 + $0x30] sm:$0xff] %v441_v50  ;;  %s1032_s25 = smov %s460_s30 }
  0xd4   : >> { %444 = vst [vmem:[%s787_s15 + $0x38] sm:$0xff] %v443_v51 }
  0xd5   : >> { %446 = vst [vmem:[%s787_s15 + $0x40] sm:$0xff] %v445_v52  ;;  %425 = sbr.rel (!%p422_p12) target bundleno = 204 (0xcc), region = 122 }
  0xd6   : >> { %448 = vst [vmem:[%s787_s15 + $0x48] sm:$0xff] %v447_v53 }
  0xd7   : >> { %450 = vst [vmem:[%s787_s15 + $0x50] sm:$0xff] %v449_v54 }
  0xd8   : >> { %452 = vst [vmem:[%s787_s15 + $0x58] sm:$0xff] %v451_v55 }
  0xd9   : >> { %454 = vst [vmem:[%s787_s15 + $0x60] sm:$0xff] %v453_v56  ;;  %s1031_s15 = smov %s461_s4 }
  0xda PF: > { %726 = sdivrem.u32 %s1038_s12, 13 }
  0xdb   : > { %s612_s5 = smul.u32 104, %s944_s20 }
  0xdd   : > { %s1009_s6 = scalar_lea.vmem %s903_s14, %s612_s5 [#allocation2]   ;;  %s468_s7 = scalar_lea.vmem %s938_s22, %s612_s5  }
  0xe3   : > { %s727_s8 = spop.drf %726 }
  0xe4   : > { %s728_s9 = spop.drf %726 }
  0xe5   : > { %p614_p13 = scmp.le.s32.totalorder %s728_s9, 0 }
  0xe6   : > { %s801_s10 = smov (!%p614_p13), %s468_s7   ;;  %s805_s11 = smov (!%p614_p13), %s1009_s6  }
  0xe7   : > { %559 = sbr.rel (%p614_p13) target bundleno = 244 (0xf4), region = 127  ;;  %s809_s17 = smov (!%p614_p13), 0  }
  0xe8   : > { %s813_s18 = smov (!%p614_p13), 0  }
  0xec LB: >> { %v478_v57 = vld [vmem:[%s807_s11] sm:$0xff]  ;;  %s480_s14 = sadd.s32 1, %s811_s17  ;;  %s472_s18 = sadd.s32 1, %s815_s18   ;;  %s815_s18 = sphi %s813_s18, %s472_s18   ;;  %s811_s17 = sphi %s809_s17, %s810_s17   ;;  %s807_s11 = sphi %s805_s11, %s485_s11   ;;  %s803_s10 = sphi %s801_s10, %s486_s10  }
  0xed   : >> { %479 = vst [vmem:[%s803_s10] sm:$0xff] %v478_v57  ;;  %p481_p0 = scmp.ge.s32.totalorder %s480_s14, %s728_s9  ;;  %p471_p1 = scmp.ge.s32.totalorder %s472_s18, %s728_s9 }
  0xef   : >> { %s1042_s14 = smov (%p481_p0, %s480_s14), 0  ;;  %474 = sbr.rel (!%p471_p1) target bundleno = 236 (0xec), region = 133 }
  0xf0   : >> { %s615_s12 = sshll.u32 %s1042_s14, 3  ;;  %s810_s17 = smov %s1042_s14  }
  0xf1   : >> { %s485_s11 = scalar_lea.vmem %s1009_s6, %s615_s12 [#allocation2]   ;;  %s486_s10 = scalar_lea.vmem %s468_s7, %s615_s12  }
  0xf4 PF: > { %p10_p2 = scmp.ge.s32.totalorder %s852_s16, 4   ;;  %s1034_s12 = smov %s779_s13 }
  0xf5   : > { %s1035_s13 = smov %s860_s19  ;;  %s1036_s14 = smov %s852_s16 }
  0xf6   :  { %12 = sbr.rel (!%p10_p2) target bundleno = 2 (0x2), region = 144 }

</bundles_post_ra>
